<compile_context>
chip_gen: v6e
topology: v6e:2x2x1
jax: 0.10.0
libtpu: 0.0.40
codegen_flags: <defaults>
</compile_context>

<pallas_src>
import numpy as np
import jax
import jax.numpy as jnp
from jax import lax
from jax.experimental import pallas as pl
from jax.experimental.pallas import tpu as pltpu

LN_EPS = 1e-5  # torch.nn.LayerNorm default eps (roberta-style embeddings LayerNorm)


# ----------------------------- glue helpers (tiny, pure XLA) -----------------------------

def _adaptive_pool_matrix(in_size, out_size):
    """Row-stochastic matrix realizing torch AdaptiveAvgPool bin semantics along one axis."""
    P = np.zeros((out_size, in_size), np.float32)
    for t in range(out_size):
        start = (t * in_size) // out_size
        end = -((-(t + 1) * in_size) // out_size)  # ceil((t+1)*in/out)
        P[t, start:end] = 1.0 / (end - start)
    return jnp.asarray(P)


def _adaptive_pool_tokens(feat_nchw, image_token_size):
    """AdaptiveAvgPool2d((T, 1)) + flatten(2) + transpose(1, 2)  ->  (B, T, C)."""
    B, C, H, W = feat_nchw.shape
    P = _adaptive_pool_matrix(H, image_token_size)          # (T, H)
    x_h = feat_nchw.mean(axis=3)                            # width bin covers all W: (B, C, H)
    return jnp.einsum("th,bch->btc", P, x_h)                # (B, T, C)


def _choose_batch_block(batch, group, max_bb=32):
    """Pick BB dividing `batch`.

    Preferences (in order): BB*group multiple of 16 (unmasked bf16 loads), multiple of 8
    (block legality), even grid (splits cleanly across v7x's two TensorCores), then the
    largest BB (amortizes per-step overhead on single-TC v5e/v6e). BB is capped at batch//2
    so the parallel grid axis always has >= 2 steps when batch allows it.
    """
    cap = max(1, min(max_bb, batch // 2)) if batch >= 2 else 1
    candidates = [bb for bb in range(cap, 0, -1) if batch % bb == 0]

    def score(bb):
        rows = bb * group
        grid = batch // bb
        return (rows % 16 == 0, rows % 8 == 0, grid % 2 == 0, bb)

    best = max(candidates, key=score)
    if (best * group) % 8 != 0:
        return batch  # whole batch in one full-array block (always legal)
    return best


def _vmem_limit_bytes(n_rows, C, D, out_dtype, stream_buffers):
    """Working-set-derived scoped-VMEM budget (invariants single-buffered)."""
    nbuf = 2 if stream_buffers is None else stream_buffers
    x_blk = n_rows * C * 2                                   # bf16 tokens
    out_blk = n_rows * D * jnp.dtype(out_dtype).itemsize
    invariants = C * D * 2 + n_rows * D * 4 + 2 * D * 4      # w(bf16) + const(f32) + gamma/beta
    ws = nbuf * (x_blk + out_blk) + invariants
    # 8 MiB headroom, floor at the 32 MiB scoped default. Keep the budget <= ~48 MiB when
    # targeting v7x (64 MiB physical VMEM) if BB / buffering depth is raised further.
    return int(max(32 << 20, ws + (8 << 20)))


# ----------------------------------- Pallas kernel ---------------------------------------

def image_embeddings_kernel(x_ref, w_ref, const_ref, gamma_ref, beta_ref, out_ref):
    # x_ref:     (BB*(T+2), C) bf16  pooled image tokens, zero rows at the CLS/SEP slots
    # w_ref:     (C, D)        bf16  projection weight
    # const_ref: (BB*(T+2), D) f32   per-row additive constant:
    #                                  image rows -> b_proj + pos[p] + token_type[0]
    #                                  CLS/SEP    -> word_emb[cls/sep] + pos[p] + token_type[0]
    # gamma/beta:(1, D)        f32   LayerNorm affine
    # out_ref:   (BB*(T+2), D) f32 or bf16
    proj = jnp.dot(x_ref[...], w_ref[...], preferred_element_type=jnp.float32)
    emb = proj + const_ref[...]            # zero x rows => CLS/SEP come purely from const

    # LayerNorm over the hidden dim (biased variance, f32 stats — matches torch).
    mean = jnp.mean(emb, axis=-1, keepdims=True)
    var = jnp.mean((emb - mean) ** 2, axis=-1, keepdims=True)
    ln = (emb - mean) * lax.rsqrt(var + LN_EPS) * gamma_ref[...] + beta_ref[...]

    out_ref[...] = ln.astype(out_ref.dtype)


# ------------------------------------- wrapper -------------------------------------------

def image_embeddings_forward(feat_nchw, params, image_token_size,
                             batch_block=None, out_dtype=jnp.float32, stream_buffers=None):
    B, C, H, W = feat_nchw.shape
    T = image_token_size
    Tp2 = T + 2
    D = params["w_proj"].shape[1]

    BB = batch_block if batch_block is not None else _choose_batch_block(B, Tp2)
    assert B % BB == 0, (B, BB)
    n_rows = BB * Tp2
    assert n_rows % 8 == 0 or BB == B, (BB, Tp2)

    # --- glue: adaptive pool + const precompute (tiny tensors, runs once) ---
    pooled = _adaptive_pool_tokens(feat_nchw, T).astype(jnp.bfloat16)    # (B, T, C) bf16
    # One zero row before/after each group so the kernel sees a dense (BB*(T+2), C) slab
    # and never needs an in-kernel concatenate / scatter.
    x = jnp.pad(pooled, ((0, 0), (1, 1), (0, 0))).reshape(B * Tp2, C)    # (B*(T+2), C) bf16

    w = params["w_proj"].astype(jnp.bfloat16)                            # (C, D)
    gamma = params["ln_gamma"]                                           # (1, D)
    beta = params["ln_beta"]                                             # (1, D)

    # NOTE: the original module indexes position_embeddings with arange(T+2) directly
    # (it bypasses the RoBERTa padding_idx offset), so pos_emb[:T+2] is the faithful map.
    pos = params["pos_emb"][:Tp2]                                        # (T+2, D)
    ttype = params["type_emb"][0]                                        # (D,)
    const = params["b_proj"] + pos + ttype[None, :]                      # (T+2, D) image rows
    const = const.at[0].set(params["word_emb"][params["cls_id"]] + pos[0] + ttype)
    const = const.at[Tp2 - 1].set(params["word_emb"][params["sep_id"]] + pos[Tp2 - 1] + ttype)
    const_t = jnp.tile(const, (BB, 1))                                   # (BB*(T+2), D)

    invariant = dict(pipeline_mode=pl.Buffered(buffer_count=1))  # fetched once; no 2x VMEM
    streaming = ({} if stream_buffers is None
                 else dict(pipeline_mode=pl.Buffered(buffer_count=stream_buffers)))

    out2d = pl.pallas_call(
        image_embeddings_kernel,
        out_shape=jax.ShapeDtypeStruct((B * Tp2, D), out_dtype),
        grid_spec=pltpu.PrefetchScalarGridSpec(
            num_scalar_prefetch=0,
            grid=(B // BB,),
            in_specs=[
                pl.BlockSpec((n_rows, C), lambda i: (i, 0), **streaming),
                pl.BlockSpec((C, D), lambda i: (0, 0), **invariant),
                pl.BlockSpec((n_rows, D), lambda i: (0, 0), **invariant),
                pl.BlockSpec((1, D), lambda i: (0, 0), **invariant),
                pl.BlockSpec((1, D), lambda i: (0, 0), **invariant),
            ],
            out_specs=pl.BlockSpec((n_rows, D), lambda i: (i, 0), **streaming),
        ),
        compiler_params=pltpu.CompilerParams(
            dimension_semantics=("parallel",),
            vmem_limit_bytes=_vmem_limit_bytes(n_rows, C, D, out_dtype, stream_buffers),
        ),
    )(x, w, const_t, gamma, beta)

    return out2d.reshape(B, Tp2, D)


# ------------------------------------ reference -------------------------------------------

def reference_forward(feat_nchw, params, image_token_size):
    """Pure-JAX reference mirroring the PyTorch forward (eval mode).

    Uses the same bf16 mixed precision for the projection matmul as the kernel
    (f32 accumulation); everything else is f32.
    """
    B = feat_nchw.shape[0]
    T = image_token_size
    D = params["w_proj"].shape[1]
    pooled = _adaptive_pool_tokens(feat_nchw, T)                               # (B, T, C)
    proj = jnp.dot(pooled.astype(jnp.bfloat16),
                   params["w_proj"].astype(jnp.bfloat16),
                   preferred_element_type=jnp.float32) + params["b_proj"][0]   # (B, T, D)
    cls = jnp.broadcast_to(params["word_emb"][params["cls_id"]], (B, 1, D))
    sep = jnp.broadcast_to(params["word_emb"][params["sep_id"]], (B, 1, D))
    seq = jnp.concatenate([cls, proj, sep], axis=1)                            # (B, T+2, D)
    emb = seq + params["pos_emb"][:T + 2][None] + params["type_emb"][0][None, None]
    mean = emb.mean(-1, keepdims=True)
    var = ((emb - mean) ** 2).mean(-1, keepdims=True)
    return (emb - mean) * lax.rsqrt(var + LN_EPS) * params["ln_gamma"][0] + params["ln_beta"][0]


def init_params(key, feat_channels, hidden, vocab, max_pos, type_vocab):
    ks = jax.random.split(key, 6)
    return {
        "w_proj": 0.02 * jax.random.normal(ks[0], (feat_channels, hidden), jnp.float32),
        "b_proj": 0.02 * jax.random.normal(ks[1], (1, hidden), jnp.float32),
        "word_emb": 0.02 * jax.random.normal(ks[2], (vocab, hidden), jnp.float32),
        "pos_emb": 0.02 * jax.random.normal(ks[3], (max_pos, hidden), jnp.float32),
        "type_emb": 0.02 * jax.random.normal(ks[4], (type_vocab, hidden), jnp.float32),
        "ln_gamma": jnp.ones((1, hidden), jnp.float32),
        "ln_beta": jnp.zeros((1, hidden), jnp.float32),
        "cls_id": 0,   # tokenizer.cls_token_id
        "sep_id": 2,   # tokenizer.sep_token_id
    }


if __name__ == "__main__":
    # Small-scale stand-in shapes (real module: C=2048 backbone channels, D=1024 hidden,
    # 7x7 feature map). H=W=7 exercises the unequal-bin adaptive-pooling path.
    B, C, H, W = 8, 256, 7, 7
    T = 6            # image_token_size  -> T+2 = 8 rows per item
    D = 128          # transformer hidden size
    VOCAB, MAX_POS, TYPE_VOCAB = 32, 16, 2

    key = jax.random.PRNGKey(0)
    k_feat, k_par = jax.random.split(key)
    feat = jax.random.normal(k_feat, (B, C, H, W), jnp.float32)   # backbone output (NCHW)
    params = init_params(k_par, C, D, VOCAB, MAX_POS, TYPE_VOCAB)

    ref = jax.block_until_ready(reference_forward(feat, params, T))

    # f32 output path. Auto batch block picks BB=4 -> 32-row (16-aligned) blocks, grid=2
    # (even, so both v7x TensorCores get a step).
    out = jax.block_until_ready(image_embeddings_forward(feat, params, T))
    assert out.shape == (B, T + 2, D), out.shape
    assert jnp.allclose(out, ref, rtol=1e-3, atol=1e-3), "f32 mismatch vs reference"

    # bf16 output path (halves HBM writeback where the step is memory-bound, e.g. v6e/v7x).
    out_bf16 = jax.block_until_ready(
        image_embeddings_forward(feat, params, T, out_dtype=jnp.bfloat16))
    assert out_bf16.dtype == jnp.bfloat16
    assert jnp.allclose(out_bf16.astype(jnp.float32), ref, rtol=2e-2, atol=2e-2), \
        "bf16 mismatch vs reference"

    print("KERNEL_OK")
</pallas_src>

<mosaic_0001>
module attributes {stable_mosaic.version = 11 : i64} {
  func.func @image_embeddings_kernel(%arg0: i32, %arg1: memref<32x256xbf16, #tpu.memory_space<vmem>>, %arg2: memref<256x128xbf16, #tpu.memory_space<vmem>>, %arg3: memref<32x128xf32, #tpu.memory_space<vmem>>, %arg4: memref<1x128xf32, #tpu.memory_space<vmem>>, %arg5: memref<1x128xf32, #tpu.memory_space<vmem>>, %arg6: memref<32x128xf32, #tpu.memory_space<vmem>>) attributes {dimension_semantics = [#tpu.dimension_semantics<parallel>], iteration_bounds = array<i64: 2>, scalar_prefetch = 0 : i64, scratch_operands = 0 : i64, tpu.core_type = #tpu.core_type<tc>, window_params = [{transform_indices = @transform_0, window_bounds = array<i64: 32, 256>}, {pipeline_mode = #tpu.pipeline_mode<synchronous>, transform_indices = @transform_1, window_bounds = array<i64: 256, 128>}, {pipeline_mode = #tpu.pipeline_mode<synchronous>, transform_indices = @transform_2, window_bounds = array<i64: 32, 128>}, {pipeline_mode = #tpu.pipeline_mode<synchronous>, transform_indices = @transform_3, window_bounds = array<i64: 1, 128>}, {pipeline_mode = #tpu.pipeline_mode<synchronous>, transform_indices = @transform_4, window_bounds = array<i64: 1, 128>}, {transform_indices = @transform_5, window_bounds = array<i64: 32, 128>}]} {
    %c0 = arith.constant 0 : index
    %c0_0 = arith.constant 0 : index
    %0 = vector.load %arg1[%c0, %c0_0] : memref<32x256xbf16, #tpu.memory_space<vmem>>, vector<32x256xbf16>
    %c0_1 = arith.constant 0 : index
    %c0_2 = arith.constant 0 : index
    %1 = vector.load %arg2[%c0_1, %c0_2] : memref<256x128xbf16, #tpu.memory_space<vmem>>, vector<256x128xbf16>
    %cst = arith.constant dense<0.000000e+00> : vector<32x128xf32>
    %2 = tpu.matmul %0, %1, %cst {dimension_numbers = #tpu.dot_dimension_numbers<[1], [0], [0], [1], [0, 0, 1, 1], [], []>} : vector<32x256xbf16>, vector<256x128xbf16>, vector<32x128xf32> -> vector<32x128xf32>
    %c0_3 = arith.constant 0 : index
    %c0_4 = arith.constant 0 : index
    %3 = vector.load %arg3[%c0_3, %c0_4] : memref<32x128xf32, #tpu.memory_space<vmem>>, vector<32x128xf32>
    %4 = arith.addf %2, %3 : vector<32x128xf32>
    %cst_5 = arith.constant dense<0.000000e+00> : vector<32xf32>
    %5 = vector.multi_reduction <add>, %4, %cst_5 [1] : vector<32x128xf32> to vector<32xf32>
    %6 = vector.shape_cast %5 : vector<32xf32> to vector<32x1xf32>
    %cst_6 = arith.constant 1.280000e+02 : f32
    %7 = vector.broadcast %cst_6 : f32 to vector<32x1xf32>
    %8 = arith.divf %6, %7 : vector<32x1xf32>
    %9 = vector.broadcast %8 : vector<32x1xf32> to vector<32x128xf32>
    %10 = arith.subf %4, %9 : vector<32x128xf32>
    %11 = arith.mulf %10, %10 : vector<32x128xf32>
    %cst_7 = arith.constant dense<0.000000e+00> : vector<32xf32>
    %12 = vector.multi_reduction <add>, %11, %cst_7 [1] : vector<32x128xf32> to vector<32xf32>
    %13 = vector.shape_cast %12 : vector<32xf32> to vector<32x1xf32>
    %cst_8 = arith.constant 1.280000e+02 : f32
    %14 = vector.broadcast %cst_8 : f32 to vector<32x1xf32>
    %15 = arith.divf %13, %14 : vector<32x1xf32>
    %16 = vector.broadcast %8 : vector<32x1xf32> to vector<32x128xf32>
    %17 = arith.subf %4, %16 : vector<32x128xf32>
    %cst_9 = arith.constant 9.99999974E-6 : f32
    %18 = vector.broadcast %cst_9 : f32 to vector<32x1xf32>
    %19 = arith.addf %15, %18 : vector<32x1xf32>
    %20 = math.rsqrt %19 : vector<32x1xf32>
    %21 = vector.broadcast %20 : vector<32x1xf32> to vector<32x128xf32>
    %22 = arith.mulf %17, %21 : vector<32x128xf32>
    %c0_10 = arith.constant 0 : index
    %c0_11 = arith.constant 0 : index
    %23 = vector.load %arg4[%c0_10, %c0_11] : memref<1x128xf32, #tpu.memory_space<vmem>>, vector<1x128xf32>
    %24 = vector.broadcast %23 : vector<1x128xf32> to vector<32x128xf32>
    %25 = arith.mulf %22, %24 : vector<32x128xf32>
    %c0_12 = arith.constant 0 : index
    %c0_13 = arith.constant 0 : index
    %26 = vector.load %arg5[%c0_12, %c0_13] : memref<1x128xf32, #tpu.memory_space<vmem>>, vector<1x128xf32>
    %27 = vector.broadcast %26 : vector<1x128xf32> to vector<32x128xf32>
    %28 = arith.addf %25, %27 : vector<32x128xf32>
    %c0_14 = arith.constant 0 : index
    %c0_15 = arith.constant 0 : index
    %29 = vector.load %arg6[%c0_14, %c0_15] : memref<32x128xf32, #tpu.memory_space<vmem>>, vector<32x128xf32>
    tpu.vector_store %arg6[%c0_14, %c0_15], %28 {strides = array<i32>} : memref<32x128xf32, #tpu.memory_space<vmem>>, vector<32x128xf32>,
    return
  }
  func.func @transform_0(%arg0: i32) -> (i32, i32) {
    %c0_i32 = arith.constant 0 : i32
    %c0_i32_0 = arith.constant 0 : i32
    return %arg0, %c0_i32 : i32, i32
  }
  func.func @transform_1(%arg0: i32) -> (i32, i32) {
    %c0_i32 = arith.constant 0 : i32
    %c0_i32_0 = arith.constant 0 : i32
    %c0_i32_1 = arith.constant 0 : i32
    return %c0_i32, %c0_i32_0 : i32, i32
  }
  func.func @transform_2(%arg0: i32) -> (i32, i32) {
    %c0_i32 = arith.constant 0 : i32
    %c0_i32_0 = arith.constant 0 : i32
    %c0_i32_1 = arith.constant 0 : i32
    return %c0_i32, %c0_i32_0 : i32, i32
  }
  func.func @transform_3(%arg0: i32) -> (i32, i32) {
    %c0_i32 = arith.constant 0 : i32
    %c0_i32_0 = arith.constant 0 : i32
    %c0_i32_1 = arith.constant 0 : i32
    return %c0_i32, %c0_i32_0 : i32, i32
  }
  func.func @transform_4(%arg0: i32) -> (i32, i32) {
    %c0_i32 = arith.constant 0 : i32
    %c0_i32_0 = arith.constant 0 : i32
    %c0_i32_1 = arith.constant 0 : i32
    return %c0_i32, %c0_i32_0 : i32, i32
  }
  func.func @transform_5(%arg0: i32) -> (i32, i32) {
    %c0_i32 = arith.constant 0 : i32
    %c0_i32_0 = arith.constant 0 : i32
    return %arg0, %c0_i32 : i32, i32
  }
}

</mosaic_0001>

<bundles_post_ra>
// kernel: tpu_custom_call.1
= control target key start
LH: loop header
LB: loop body
LE: loop exit
PB: predicated region body
PF: predicated region fallthrough
CT: control target
= control target key end

     0   :  { %10 = vsyncpa [#allocation3], 0  ;;  %s1249_s0 = inlined_call_operand.hbm [shape: bf16[64,256], index: 0, kind: input, shape index: {}]   ;;  %s1250_s1 = inlined_call_operand.hbm [shape: bf16[256,128], index: 1, kind: input, shape index: {}]   ;;  %s1251_s2 = inlined_call_operand.hbm [shape: f32[32,128], index: 2, kind: input, shape index: {}]   ;;  %s1252_s3 = inlined_call_operand.vmem [shape: f32[1,128], index: 3, kind: input, shape index: {}]   ;;  %s1253_s4 = inlined_call_operand.vmem [shape: f32[1,128], index: 4, kind: input, shape index: {}]   ;;  %s1254_s5 = inlined_call_operand.hbm [shape: f32[64,128], index: 5, kind: output, shape index: {}]  }
   0x1   :  { %12 = vsyncpa [#allocation3 + $0x1], 0 }
   0x2   :  { %13 = vsyncpa [#allocation6], 0 }
   0x3   :  { %14 = vsyncpa [#allocation4], 0 }
   0x4   :  { %16 = vsyncpa [#allocation4 + $0x1], 0  ;;  %s1039_s18 = smov 0   ;;  %s1041_s19 = smov 0  }
   0x5   :  { %s1043_s20 = smov 0   ;;  %s1045_s21 = smov 0  }
   0x6 LB: > { %s1060_s22 = sadd.s32 4294967295, %s997_s21   ;;  %s658_s23 = sadd.s32 4294967294, %s997_s21   ;;  %s997_s21 = sphi %s1045_s21, %s1278_s21   ;;  %s993_s20 = sphi %s1043_s20, %s1277_s20   ;;  %s989_s19 = sphi %s1041_s19, %s1276_s19   ;;  %s985_s18 = sphi %s1039_s18, %s1275_s18  }
   0x7   : > { %p42_p0 = scmp.ne.s32.totalorder %s989_s19, %s985_s18  ;;  %p1255_p1 = scmp.eq.s32.totalorder %s1060_s22, 0 }
   0x8   : > { %p156_p3 = scmp.eq.s32.totalorder %s658_s23, 1  ;;  %p659_p5 = scmp.ge.s32.totalorder %s997_s21, 1 }
   0x9   : > { %p1069_p4 = por %p1255_p1, %p42_p0  ;;  %p163_p7 = scmp.lt.s32.totalorder %s997_s21, 3 }
   0xa   : > { %p1074_p6 = por %p156_p3, %p42_p0  ;;  %s999_s27 = smov [#allocation5]  }
   0xb   : > { %s1260_s24 = scalar_select %p1069_p4, 1, 0 }
   0xc   : > { %s1261_s25 = scalar_select %p1074_p6, 1, 0 }
   0xd   : > { %p1079_p8 = pnand %p659_p5, %p163_p7  ;;  %s175_s28 = sshll.u32 %s999_s27, 4  ;;  %s176_s28 = int_to_ptr.vmem [resolvable:$true] %s175_s28 }
   0xe   : > { %s1000_s30 = smov [#allocation7]   ;;  %s860_s7 = scalar_lea.vmem %s176_s28, 2048 }
   0xf   : > { %s1262_s26 = scalar_select %p1079_p8, 1, 0 }
  0x10   : > { %p758_p9 = pneg %p1079_p8  ;;  %s188_s6 = sshll.u32 %s1000_s30, 4  ;;  %s189_s6 = int_to_ptr.vmem [resolvable:$true] %s188_s6 }
  0x11   : > { %p861_p13 = scmp.ne.s32.totalorder %s176_s28, %s860_s7  ;;  %p868_p5 = scmp.lt.s32.totalorder %s176_s28, %s176_s28 }
  0x12   : > { %p1088_p11 = pnand %p758_p9, %p1255_p1  ;;  %p869_p7 = scmp.lt.s32.totalorder %s860_s7, %s860_s7 }
  0x14   : > { %p851_p12 = pneg %p1088_p11  ;;  %p870_p10 = por %p869_p7, %p868_p5 }
  0x16   : > { %p863_p0 = pnand %p861_p13, %p851_p12 }
  0x18   : > { %p864_p3 = pneg %p863_p0 }
  0x1a   : > { %p871_p9 = pnand %p870_p10, %p864_p3 }
  0x1c   : > { %874 = shalt.err (!%p871_p9)
}
  0x1d   : > { %s1001_s8 = smov 64   ;;  %s1002_s9 = smov 4  }
  0x1e   : > { %761 = dma.hbm_to_vmem [thread:$0]  (!%p1088_p11), %s1250_s1, 2048, %s176_s28, [#allocation6], %s1001_s8, %s1001_s8, %s1002_s9  }
  0x1f   : > { %s886_s12 = scalar_lea.vmem %s189_s6, 512  ;;  %p894_p2 = scmp.lt.s32.totalorder %s189_s6, %s189_s6 }
  0x20   : > { %p887_p1 = scmp.ne.s32.totalorder %s189_s6, %s886_s12  ;;  %p895_p6 = scmp.lt.s32.totalorder %s886_s12, %s886_s12 }
  0x22   : > { %p889_p13 = pnand %p887_p1, %p851_p12  ;;  %p896_p5 = por %p895_p6, %p894_p2 }
  0x24   : > { %p890_p0 = pneg %p889_p13 }
  0x26   : > { %p897_p10 = pnand %p896_p5, %p890_p0 }
  0x28   : > { %900 = shalt.err (!%p897_p10)
}
  0x29   : > { %s1256_s13 = smov 128   ;;  %s1004_s14 = smov 8  }
  0x2a   : > { %764 = dma.hbm_to_vmem [thread:$0]  (!%p1088_p11), %s1251_s2, 512, %s189_s6, [#allocation6], %s1256_s13, %s1256_s13, %s1004_s14  }
  0x2b   : > { %s1114_s17 = sadd.s32 1, %s997_s21   ;;  %s29_s27 = sadd.s32 1, %s993_s20 }
  0x2c   : > { %s26_s23 = ssub.s32 %s997_s21, %s1114_s17  ;;  %p36_p2 = scmp.ne.s32.totalorder %s993_s20, %s989_s19 }
  0x2d   : > { %p27_p1 = scmp.eq.s32.totalorder %s26_s23, 0  ;;  %p37_p6 = scmp.eq.s32.totalorder %s997_s21, 0 }
  0x2e   : > { %p1264_p3 = scmp.eq.s32.totalorder %s1060_s22, 1  ;;  %p775_p9 = scmp.lt.s32.totalorder %s997_s21, 2 }
  0x2f   : > { %s1123_s28 = scalar_select %p27_p1, %s993_s20, %s29_s27  }
  0x30   : > { %p38_p12 = por %p37_p6, %p36_p2  ;;  %p1127_p7 = por %p1264_p3, %p36_p2 }
  0x31   : > { %s208_s30 = sand.u32 1, %s993_s20   ;;  %s700_s6 = sshll.u32 %s997_s21, 9 }
  0x32   : > { %s1265_s29 = scalar_select %p1127_p7, 1, 0 }
  0x33   : > { %s663_s7 = sshll.u32 %s208_s30, 5  ;;  %s1137_s10 = scalar_lea.hbm %s1249_s0, %s700_s6 }
  0x34   : > { %s212_s11 = scalar_lea.vmem [#allocation2], %s663_s7  ;;  %p1141_p11 = pnand %p775_p9, %p38_p12 }
  0x35   : > { %s220_s12 = sshll.u32 %s212_s11, 4  ;;  %s1145_s16 = scalar_lea.sflag [#allocation3], %s208_s30  ;;  %s1139_s12 = int_to_ptr.vmem [resolvable:$true] %s220_s12 }
  0x36   : > { %s901_s23 = scalar_lea.hbm %s1137_s10, 512  ;;  %p903_p0 = pneg %p1141_p11 }
  0x37   : > { %p902_p13 = scmp.ne.s32.totalorder %s1137_s10, %s901_s23  ;;  %s906_s7 = scalar_lea.hbm %s1249_s0, 1024 }
  0x38   : > { %p907_p1 = scmp.lt.s32.totalorder %s1137_s10, %s1249_s0  ;;  %p908_p2 = scmp.lt.s32.totalorder %s906_s7, %s901_s23 }
  0x39   : > { %p904_p5 = pnand %p903_p0, %p902_p13 }
  0x3a   : > { %p909_p6 = por %p908_p2, %p907_p1 }
  0x3b   : > { %p905_p10 = pneg %p904_p5 }
  0x3d   : > { %p910_p12 = pnand %p909_p6, %p905_p10 }
  0x3f   : > { %913 = shalt.err (!%p910_p12)
}
  0x40   : > { %s914_s30 = scalar_lea.vmem %s1139_s12, 512  ;;  %s1005_s11 = smov [#allocation2]  }
  0x41   : > { %p915_p3 = scmp.ne.s32.totalorder %s1139_s12, %s914_s30  ;;  %s919_s13 = sshll.u32 %s1005_s11, 4  ;;  %s920_s13 = int_to_ptr.vmem [resolvable:$false] %s919_s13 }
  0x42   : > { %s921_s27 = scalar_lea.vmem %s920_s13, 1024  ;;  %p922_p5 = scmp.lt.s32.totalorder %s1139_s12, %s920_s13 }
  0x43   : > { %p917_p9 = pnand %p915_p3, %p903_p0  ;;  %p923_p7 = scmp.lt.s32.totalorder %s921_s27, %s914_s30 }
  0x45   : > { %p918_p13 = pneg %p917_p9  ;;  %p924_p4 = por %p923_p7, %p922_p5 }
  0x47   : > { %p925_p8 = pnand %p924_p4, %p918_p13 }
  0x49   : > { %928 = shalt.err (!%p925_p8)
}
  0x4a   : > { %s1267_s23 = smov 128   ;;  %p1268_p0 = scmp.ne.s32.totalorder %s1262_s26, 0 }
  0x4b   : > { %768 = dma.hbm_to_vmem [thread:$0]  (!%p1141_p11), %s1137_s10, 512, %s1139_s12, %s1145_s16, %s1267_s23, %s1267_s23, %s1004_s14  }
  0x4c   : > { %232 = sbr.rel (%p1268_p0) target bundleno = 645 (0x285), region = 40  ;;  %s1172_s6 = sand.u32 (!%p1268_p0), 1, %s989_s19  }
  0x4d   : > { %s668_s13 = sshll.u32 (!%p1268_p0), %s1172_s6, 5  ;;  %s235_s7 = scalar_lea.sflag (!%p1268_p0), [#allocation3], %s1172_s6 }
  0x4e   : > { %s1178_s15 = scalar_lea.vmem (!%p1268_p0), [#allocation2], %s668_s13  ;;  %p1269_p4 = scmp.ne.s32.totalorder (!%p1268_p0), %s1260_s24, 0 }
  0x51   : > { %972 = dma.done.wait (%p1269_p4), %s235_s7, 512  }
  0x52   : > { %974 = vsyncadd (%p1269_p4), %s235_s7, 4294966784  ;;  %p1270_p8 = scmp.eq.s32.totalorder %s1060_s22, 0 }
  0x54   : > { %976 = dma.done.wait (%p1270_p8), [#allocation6], 2560   ;;  %p1271_p7 = pmov %p1270_p8 }
  0x55   : > { %v819_v0 = vld [vmem:[#allocation5 + $0x78] sm:$0xff]   ;;  %v821_v2 = vld [vmem:[#allocation5 + $0x70] sm:$0xff]   ;;  %v823_v4 = vld [vmem:[#allocation5 + $0x68] sm:$0xff]   ;;  %s272_s12 = scalar_lea.vmem [#allocation8], %s668_s13  ;;  %s701_s16 = sshll.u32 %s1060_s22, 9 }
  0x56   : > { %978 = vsyncadd (%p1271_p7), [#allocation6], 4294964736  ;;  %v820_v1 = vld [vmem:[#allocation5 + $0x38] sm:$0xff]   ;;  %702 = vmatprep.subr.bf16.mxu0 %v819_v0  ;;  %730 = vmatprep.subr.bf16.mxu1 %v819_v0  ;;  %v822_v3 = vld [vmem:[#allocation5 + $0x30] sm:$0xff]   ;;  %s566_s8 = sshll.u32 %s272_s12, 4  ;;  %s1204_s11 = scalar_lea.hbm %s1254_s5, %s701_s16  ;;  %s1206_s8 = int_to_ptr.vmem [resolvable:$true] %s566_s8 }
  0x57   : > { %703 = vmatpush3.bf16.msra.mxu0 %v820_v1  ;;  %738 = vmatpush3.bf16.msra.mxu1 %v820_v1  ;;  %v824_v5 = vld [vmem:[#allocation5 + $0x28] sm:$0xff]   ;;  %v825_v6 = vld [vmem:[#allocation5 + $0x60] sm:$0xff]   ;;  %v827_v8 = vld [vmem:[#allocation5 + $0x58] sm:$0xff]   ;;  %s553_s27 = scalar_lea.sflag [#allocation4], %s1172_s6  ;;  %s929_s23 = scalar_lea.vmem %s1206_s8, 512 }
  0x58   : > { %704 = vmatprep.subr.bf16.mxu0 %v821_v2  ;;  %731 = vmatprep.subr.bf16.mxu1 %v821_v2  ;;  %v826_v7 = vld [vmem:[#allocation5 + $0x20] sm:$0xff]   ;;  %v828_v9 = vld [vmem:[#allocation5 + $0x18] sm:$0xff]   ;;  %v829_v10 = vld [vmem:[#allocation5 + $0x50] sm:$0xff]   ;;  %p930_p11 = scmp.ne.s32.totalorder %s1206_s8, %s929_s23  ;;  %p1272_p10 = scmp.ne.s32.totalorder %s1265_s29, 0 }
  0x59   : > { %v837_v11 = vld [vmem:[%s1178_s15 + $0x4] ss:$8 sps:$4 sm:$0xff]   ;;  %v840_v12 = vld [vmem:[%s1178_s15 + $0x14] ss:$8 sps:$4 sm:$0xff]   ;;  %v835_v18 = vld [vmem:[%s1178_s15] ss:$8 sps:$4 sm:$0xff]  }
  0x5a   : > { %v830_v13 = vld [vmem:[#allocation5 + $0x10] sm:$0xff]   ;;  %v831_v14 = vld [vmem:[#allocation5 + $0x48] sm:$0xff]   ;;  %464 = vmatprep.mubr.bf16.mxu0 %v837_v11  ;;  %472 = vmatprep.mubr.bf16.mxu1 %v840_v12  ;;  %v833_v16 = vld [vmem:[#allocation5 + $0x40] sm:$0xff]   ;;  %p931_p1 = pnand %p930_p11, %p1272_p10  ;;  %s1006_s22 = smov [#allocation8]  }
  0x5b   : > { %705 = vmatpush3.bf16.msra.mxu0 %v822_v3  ;;  %739 = vmatpush3.bf16.msra.mxu1 %v822_v3  ;;  %v832_v15 = vld [vmem:[#allocation5 + $0x8] sm:$0xff]   ;;  %v834_v17 = vld [vmem:[#allocation5] sm:$0xff]   ;;  %v838_v19 = vld [vmem:[%s1178_s15 + $0x10] ss:$8 sps:$4 sm:$0xff]   ;;  %s933_s13 = sshll.u32 %s1006_s22, 4  ;;  %s934_s13 = int_to_ptr.vmem [resolvable:$false] %s933_s13 }
  0x5c   : > { %706 = vmatprep.subr.bf16.mxu0 %v823_v4  ;;  %732 = vmatprep.subr.bf16.mxu1 %v823_v4  ;;  %v314_v24 = vld [vmem:[#allocation7 + $0x10] sm:$0xff]  ;;  %v312_v25 = vld [vmem:[#allocation7] sm:$0xff]  ;;  %v315_v34 = vld [vmem:[#allocation7 + $0x18] sm:$0xff]  ;;  %p932_p2 = pneg %p931_p1  ;;  %s935_s7 = scalar_lea.vmem %s934_s13, 1024 }
  0x5d   : > { %v313_v35 = vld [vmem:[#allocation7 + $0x8] sm:$0xff]  ;;  %p936_p6 = scmp.lt.s32.totalorder %s1206_s8, %s934_s13  ;;  %p937_p12 = scmp.lt.s32.totalorder %s935_s7, %s929_s23 }
  0x5f   : > { %707 = vmatpush3.bf16.msra.mxu0 %v824_v5  ;;  %740 = vmatpush3.bf16.msra.mxu1 %v824_v5  ;;  %v692_v5 = vld [vmem:[%s1252_s3] ss:$0 sm:$0xff]  ;;  %p938_p3 = por %p937_p12, %p936_p6 }
  0x60   : > { %708 = vmatprep.subr.bf16.mxu0 %v825_v6  ;;  %733 = vmatprep.subr.bf16.mxu1 %v825_v6 }
  0x61   : > { %p939_p9 = pnand %p938_p3, %p932_p2 }
  0x63   : > { %709 = vmatpush3.bf16.msra.mxu0 %v826_v7  ;;  %741 = vmatpush3.bf16.msra.mxu1 %v826_v7  ;;  %v693_v7 = vld [vmem:[%s1253_s4] ss:$0 sm:$0xff] }
  0x64   : > { %710 = vmatprep.subr.bf16.mxu0 %v827_v8  ;;  %734 = vmatprep.subr.bf16.mxu1 %v827_v8 }
  0x67   : > { %711 = vmatpush3.bf16.msra.mxu0 %v828_v9  ;;  %742 = vmatpush3.bf16.msra.mxu1 %v828_v9 }
  0x68   : > { %712 = vmatprep.subr.bf16.mxu0 %v829_v10  ;;  %735 = vmatprep.subr.bf16.mxu1 %v829_v10 }
  0x6b   : > { %713 = vmatpush3.bf16.msra.mxu0 %v830_v13  ;;  %743 = vmatpush3.bf16.msra.mxu1 %v830_v13 }
  0x6c   : > { %714 = vmatprep.subr.bf16.mxu0 %v831_v14  ;;  %736 = vmatprep.subr.bf16.mxu1 %v831_v14 }
  0x6f   : > { %715 = vmatpush3.bf16.msra.mxu0 %v832_v15  ;;  %744 = vmatpush3.bf16.msra.mxu1 %v832_v15 }
  0x70   : > { %716 = vmatprep.subr.bf16.mxu0 %v833_v16  ;;  %737 = vmatprep.subr.bf16.mxu1 %v833_v16 }
  0x73   : > { %717 = vmatpush3.bf16.msra.mxu0 %v834_v17  ;;  %745 = vmatpush3.bf16.msra.mxu1 %v834_v17 }
  0x76   : > { %465 = vmatmul.mubr.bf16.vlgmr.msra.gmra.mxu0 %v835_v18  ;;  %473 = vmatmul.mubr.bf16.vlgmr.msra.gmra.mxu1 %v838_v19 }
 0x136   : > { %v718_v20 = vpop.f32.mrf.mxu0  ;;  %v724_v21 = vpop.f32.mrf.mxu1 }
 0x138   : > { %v719_v22 = vpop.f32.mrf.mxu0  ;;  %v725_v23 = vpop.f32.mrf.mxu1 }
 0x139   : > { %v720_v26 = vadd.f32 %v719_v22, %v718_v20  ;;  %v726_v27 = vadd.f32 %v725_v23, %v724_v21 }
 0x13a   : > { %v721_v28 = vpop.f32.mrf.mxu0  ;;  %v727_v29 = vpop.f32.mrf.mxu1 }
 0x13b   : > { %v475_v30 = vadd.f32 %v726_v27, %v314_v24  ;;  %v467_v31 = vadd.f32 %v720_v26, %v312_v25 }
 0x13c   : > { %v722_v32 = vpop.f32.mrf.mxu0  ;;  %v728_v33 = vpop.f32.mrf.mxu1 }
 0x13d   : > { %v723_v36 = vadd.f32 %v722_v32, %v721_v28  ;;  %v729_v37 = vadd.f32 %v728_v33, %v727_v29  ;;  %485 = vadd.xlane.f32.xlu1 %v475_v30  ;;  %481 = vadd.xlane.f32.xlu0 %v467_v31 }
 0x13f   : > { %v478_v38 = vadd.f32 %v729_v37, %v315_v34  ;;  %v470_v39 = vadd.f32 %v723_v36, %v313_v35 }
 0x141   : > { %487 = vadd.xlane.f32.xlu1 %v478_v38  ;;  %483 = vadd.xlane.f32.xlu0 %v470_v39 }
 0x1c6   : > { %v486_v40 = vpop.xlane.xlu1 %485  ;;  %v482_v41 = vpop.xlane.xlu0 %481 }
 0x1c7   : > { %v492_v42 = vmul.f32 0.0078125, %v486_v40  ;;  %v490_v43 = vmul.f32 0.0078125, %v482_v41 }
 0x1c9   : > { %v494_v44 = vsub.f32 %v467_v31, %v490_v43  ;;  %v496_v47 = vsub.f32 %v475_v30, %v492_v42 }
 0x1ca   : > { %v488_v45 = vpop.xlane.xlu1 %487  ;;  %v484_v46 = vpop.xlane.xlu0 %483 }
 0x1cb   : > { %v493_v48 = vmul.f32 0.0078125, %v488_v45  ;;  %v491_v49 = vmul.f32 0.0078125, %v484_v46  ;;  %v498_v50 = vmul.f32 %v494_v44, %v494_v44  ;;  %v500_v53 = vmul.f32 %v496_v47, %v496_v47 }
 0x1cd   : > { %v495_v51 = vsub.f32 %v470_v39, %v491_v49  ;;  %502 = vadd.xlane.f32.xlu0 %v498_v50  ;;  %v497_v52 = vsub.f32 %v478_v38, %v493_v48 }
 0x1cf   : > { %v499_v54 = vmul.f32 %v495_v51, %v495_v51  ;;  %v501_v55 = vmul.f32 %v497_v52, %v497_v52 }
 0x1d1   : > { %506 = vadd.xlane.f32.xlu0 %v500_v53  ;;  %504 = vadd.xlane.f32.xlu1 %v499_v54 }
 0x1d5   : > { %508 = vadd.xlane.f32.xlu1 %v501_v55 }
 0x256   : > { %v503_v56 = vpop.xlane.xlu0 %502 }
 0x257   : > { %v510_v57 = vmul.f32 0.0078125, %v503_v56 }
 0x259   : > { %v514_v58 = vadd.f32 1e-05, %v510_v57 }
 0x25a   : > { %v505_v59 = vpop.xlane.xlu1 %504  ;;  %v507_v60 = vpop.xlane.xlu0 %506 }
 0x25b   : > { %841 = vrsqrt.f32 %v514_v58  ;;  %v511_v61 = vmul.f32 0.0078125, %v505_v59  ;;  %v512_v62 = vmul.f32 0.0078125, %v507_v60 }
 0x25d   : > { %v515_v63 = vadd.f32 1e-05, %v511_v61  ;;  %v516_v0 = vadd.f32 1e-05, %v512_v62 }
 0x25e   : > { %v509_v1 = vpop.xlane.xlu1 %508 }
 0x25f   : > { %843 = vrsqrt.f32 %v515_v63  ;;  %v513_v2 = vmul.f32 0.0078125, %v509_v1 }
 0x260   : > { %845 = vrsqrt.f32 %v516_v0 }
 0x261   : > { %v517_v3 = vadd.f32 1e-05, %v513_v2 }
 0x263   : > { %847 = vrsqrt.f32 %v517_v3 }
 0x268   : > { %v842_v4 = vpop.eup %841 }
 0x269   : > { %v522_v6 = vmul.f32 %v842_v4, %v494_v44 }
 0x26b   : > { %v533_v8 = vmul.f32 %v692_v5, %v522_v6 }
 0x26c   : > { %v844_v9 = vpop.eup %843 }
 0x26d   : > { %v846_v10 = vpop.eup %845  ;;  %v544_v11 = vadd.f32 %v693_v7, %v533_v8  ;;  %v523_v12 = vmul.f32 %v844_v9, %v495_v51 }
 0x26e   : > { %v524_v13 = vmul.f32 %v846_v10, %v496_v47 }
 0x26f   : > { %548 = vst [vmem:[%s272_s12] sm:$0xff] %v544_v11  ;;  %v534_v14 = vmul.f32 %v692_v5, %v523_v12 }
 0x270   : > { %v848_v15 = vpop.eup %847  ;;  %v535_v16 = vmul.f32 %v692_v5, %v524_v13 }
 0x271   : > { %v545_v17 = vadd.f32 %v693_v7, %v534_v14  ;;  %v525_v18 = vmul.f32 %v848_v15, %v497_v52 }
 0x272   : > { %v546_v19 = vadd.f32 %v693_v7, %v535_v16 }
 0x273   : > { %549 = vst [vmem:[%s272_s12 + $0x8] sm:$0xff] %v545_v17  ;;  %v536_v20 = vmul.f32 %v692_v5, %v525_v18 }
 0x274   : > { %550 = vst [vmem:[%s272_s12 + $0x10] sm:$0xff] %v546_v19 }
 0x275   : > { %v547_v21 = vadd.f32 %v693_v7, %v536_v20 }
 0x277   : > { %551 = vst [vmem:[%s272_s12 + $0x18] sm:$0xff] %v547_v21 }
 0x278   : > { %942 = shalt.err (!%p939_p9)
}
 0x279   : > { %s943_s15 = scalar_lea.hbm %s1204_s11, 512  ;;  %s947_s14 = scalar_lea.hbm %s1254_s5, 1024 }
 0x27a   : > { %p944_p13 = scmp.ne.s32.totalorder %s1204_s11, %s943_s15  ;;  %p948_p4 = scmp.lt.s32.totalorder %s1204_s11, %s1254_s5 }
 0x27b   : > { %p949_p8 = scmp.lt.s32.totalorder %s947_s14, %s943_s15 }
 0x27c   : > { %p945_p5 = pnand %p944_p13, %p1272_p10 }
 0x27d   : > { %p950_p7 = por %p949_p8, %p948_p4 }
 0x27e   : > { %p946_p0 = pneg %p945_p5 }
 0x280   : > { %p951_p11 = pnand %p950_p7, %p946_p0 }
 0x282   : > { %954 = shalt.err (!%p951_p11)
}
 0x283   : > { %s1007_s16 = smov 128   ;;  %s1008_s9 = smov 8  }
 0x284   : > { %756 = dma.vmem_to_hbm [thread:$0]  (%p1272_p10), %s1206_s8, 512, %s1204_s11, %s553_s27, %s1007_s16, %s1007_s16, %s1008_s9  }
 0x285 PF: > { %s581_s30 = sand.u32 1, %s985_s18   ;;  %p1273_p1 = scmp.ne.s32.totalorder %s1261_s25, 0 }
 0x286   : > { %p1274_p2 = scmp.ge.s32.totalorder %s997_s21, 2  ;;  %s582_s23 = scalar_lea.sflag [#allocation4], %s581_s30 }
 0x288   : > { %p770_p6 = pnand %p1274_p2, %p1273_p1 }
 0x28a   : > { %p771_p12 = pneg %p770_p6 }
 0x28c   : > { %980 = dma.done.wait (%p771_p12), %s582_s23, 512  }
 0x28d   : > { %982 = vsyncadd (%p771_p12), %s582_s23, 4294966784  ;;  %p19_p3 = scmp.ge.s32.totalorder %s1114_s17, 4   ;;  %s1275_s18 = smov %s989_s19 }
 0x28e   : > { %s1276_s19 = smov %s993_s20  ;;  %s1277_s20 = smov %s1123_s28 }
 0x28f   : > { %s1278_s21 = smov %s1114_s17  ;;  %21 = sbr.rel (!%p19_p3) target bundleno = 6 (0x6), region = 93 }
 0x294   :  { %587 = vsyncpa [#allocation3], 1 }
 0x295   :  { %589 = vsyncpa [#allocation3 + $0x1], 1 }
 0x296   :  { %590 = vsyncpa [#allocation6], 1 }
 0x297   :  { %591 = vsyncpa [#allocation4], 1 }
 0x298   :  { %593 = vsyncpa [#allocation4 + $0x1], 1 }

</bundles_post_ra>
